<compile_context>
chip_gen: v7x
topology: tpu7x:2x2x1
jax: 0.10.0
libtpu: 0.0.40
codegen_flags: <defaults>
</compile_context>

<pallas_src>
import jax
import jax.numpy as jnp
from jax.experimental import pallas as pl
from jax.experimental.pallas import tpu as pltpu


def _fusion2_minus_fc_kernel(x1_ref, x2_ref, wa_ref, wb_ref, b_ref, o_ref):
    # x1_ref, x2_ref: (TM, D)
    # wa_ref = (W1 + W3)^T : (D, D),  wb_ref = (W2 - W3)^T : (D, D)
    # b_ref: (1, D) float32
    acc = jnp.dot(x1_ref[...], wa_ref[...], preferred_element_type=jnp.float32)
    acc = acc + jnp.dot(x2_ref[...], wb_ref[...], preferred_element_type=jnp.float32)
    o_ref[...] = (acc + b_ref[...]).astype(o_ref.dtype)


def _round_up(x, m):
    return ((x + m - 1) // m) * m


def _vmem_capacity_bytes():
    """Physical per-core VMEM; conservative 64 MiB (v7x) fallback."""
    try:
        return int(pltpu.get_tpu_info().vmem_capacity_bytes)
    except Exception:
        return 64 << 20


def _spec(shape, index_map, buffers=None):
    """BlockSpec, optionally with an explicit pipeline buffer count."""
    if buffers is not None:
        try:
            return pl.BlockSpec(shape, index_map, pipeline_mode=pl.Buffered(buffers))
        except (TypeError, AttributeError):
            pass  # older JAX without pipeline_mode: fall back to default buffering
    return pl.BlockSpec(shape, index_map)


def _choose_tile_m(m_rows, d, in_bytes, pipeline_budget_bytes):
    """M tile: double-buffered (x1 + x2 + out) traffic must fit the budget,
    aligned for the MXU, with >= 2 grid steps when M allows (megacore)."""
    per_row = 3 * 2 * d * in_bytes                      # 3 arrays x 2 buffers
    tm = max(8, pipeline_budget_bytes // max(per_row, 1))
    tm = min(tm, 2048)
    if m_rows > 8:                                      # give v7x's 2 TCs work
        tm = min(tm, _round_up(pl.cdiv(m_rows, 2), 8))
    tm = min(tm, _round_up(m_rows, 8))
    for align in (512, 256, 128, 8):                    # MXU-friendly sizes
        if tm >= align:
            return (tm // align) * align
    return 8


def fold_weights(weight, bias, compute_dtype=None):
    """Fold the concat into the weights ONCE.

    weight: torch nn.Linear layout (D, 3D); bias: (D,).
    The fold is done in float32 (matches the cat+matmul reference), then cast.
    Returns wa=(W1+W3)^T, wb=(W2-W3)^T (both (D, D)) and a (1, D) f32 bias.
    """
    D = weight.shape[0]
    w32 = weight.astype(jnp.float32)
    wa = (w32[:, :D] + w32[:, 2 * D:]).T
    wb = (w32[:, D:2 * D] - w32[:, 2 * D:]).T
    tgt = compute_dtype if compute_dtype is not None else weight.dtype
    return wa.astype(tgt), wb.astype(tgt), bias.astype(jnp.float32).reshape(1, D)


def _fusion2_call(x1, x2, wa, wb, b, out_dtype):
    M, D = x1.shape
    in_bytes = jnp.dtype(x1.dtype).itemsize
    w_bytes = jnp.dtype(wa.dtype).itemsize

    capacity = _vmem_capacity_bytes()
    headroom = max(8 << 20, capacity // 8)              # 8 MiB on 64 MiB, 16 on 128
    resident = 2 * D * D * w_bytes + D * 4              # single-buffered wa/wb + bias
    pipeline_budget = max(capacity - headroom - resident - (4 << 20), 4 << 20)

    TM = _choose_tile_m(M, D, in_bytes, pipeline_budget)
    grid_m = pl.cdiv(M, TM)

    needed = resident + 3 * 2 * TM * D * max(in_bytes, jnp.dtype(out_dtype).itemsize)
    vmem_limit = int(min(capacity - headroom, needed + (8 << 20)))
    vmem_limit = max(vmem_limit, 16 << 20)

    return pl.pallas_call(
        _fusion2_minus_fc_kernel,
        out_shape=jax.ShapeDtypeStruct((M, D), out_dtype),
        grid_spec=pltpu.PrefetchScalarGridSpec(
            num_scalar_prefetch=0,
            grid=(grid_m,),
            in_specs=[
                _spec((TM, D), lambda i: (i, 0)),               # x1 tile (pipelined)
                _spec((TM, D), lambda i: (i, 0)),               # x2 tile (pipelined)
                _spec((D, D), lambda i: (0, 0), buffers=1),     # (W1+W3)^T, resident
                _spec((D, D), lambda i: (0, 0), buffers=1),     # (W2-W3)^T, resident
                _spec((1, D), lambda i: (0, 0), buffers=1),     # bias, resident
            ],
            out_specs=pl.BlockSpec((TM, D), lambda i: (i, 0)),
        ),
        compiler_params=pltpu.CompilerParams(
            dimension_semantics=("parallel",),
            vmem_limit_bytes=vmem_limit,
        ),
    )(x1, x2, wa, wb, b)


def make_fusion2_minus_fc(weight, bias, compute_dtype=None):
    """Fold weights once and return a jitted (input1, input2) -> out.

    compute_dtype=jnp.bfloat16 halves HBM/VMEM traffic and uses the bf16-native
    MXU (accumulation stays f32); default keeps the input dtype exactly.
    """
    wa, wb, b = fold_weights(weight, bias, compute_dtype)

    @jax.jit
    def fwd(input1, input2):
        assert input1.shape == input2.shape
        *lead, D = input1.shape
        M = 1
        for s in lead:
            M *= s
        out_dtype = input1.dtype
        x1 = input1.reshape(M, D)
        x2 = input2.reshape(M, D)
        if compute_dtype is not None:
            x1 = x1.astype(compute_dtype)
            x2 = x2.astype(compute_dtype)
        out = _fusion2_call(x1, x2, wa, wb, b, out_dtype)
        return out.reshape(*lead, D)

    return fwd


def fusion2_minus_fc(input1, input2, weight, bias):
    """One-shot convenience wrapper (folds per call; prefer make_fusion2_minus_fc)."""
    return make_fusion2_minus_fc(weight, bias)(input1, input2)


if __name__ == "__main__":
    # Small shapes implied by the forward: (batch, seq, hidden)
    batch, seq, hidden = 2, 8, 32
    key = jax.random.PRNGKey(0)
    k1, k2, kw, kb = jax.random.split(key, 4)

    input1 = jax.random.normal(k1, (batch, seq, hidden), dtype=jnp.float32)
    input2 = jax.random.normal(k2, (batch, seq, hidden), dtype=jnp.float32)

    # Deterministic Linear(input_dim*3, input_dim) params (torch layout: (out, in)).
    bound = 1.0 / (3 * hidden) ** 0.5
    weight = jax.random.uniform(kw, (hidden, 3 * hidden),
                                minval=-bound, maxval=bound, dtype=jnp.float32)
    bias = jax.random.uniform(kb, (hidden,),
                              minval=-bound, maxval=bound, dtype=jnp.float32)

    fwd = make_fusion2_minus_fc(weight, bias)   # fold once, reuse across calls
    out = jax.block_until_ready(fwd(input1, input2))

    # Pure-JAX reference check of the exact PyTorch semantics.
    cat = jnp.concatenate([input1, input2, input1 - input2], axis=-1)
    ref = cat @ weight.T + bias
    assert out.shape == (batch, seq, hidden)
    assert jnp.allclose(out, ref, atol=1e-4, rtol=1e-4), (
        float(jnp.max(jnp.abs(out - ref))))

    print("KERNEL_OK")
</pallas_src>

<mosaic_0001>
module attributes {stable_mosaic.version = 11 : i64} {
  func.func @_fusion2_minus_fc_kernel(%arg0: i32, %arg1: memref<8x32xf32, #tpu.memory_space<vmem>>, %arg2: memref<8x32xf32, #tpu.memory_space<vmem>>, %arg3: memref<32x32xf32, #tpu.memory_space<vmem>>, %arg4: memref<32x32xf32, #tpu.memory_space<vmem>>, %arg5: memref<1x32xf32, #tpu.memory_space<vmem>>, %arg6: memref<8x32xf32, #tpu.memory_space<vmem>>) attributes {dimension_semantics = [#tpu.dimension_semantics<parallel>], iteration_bounds = array<i64: 2>, scalar_prefetch = 0 : i64, scratch_operands = 0 : i64, tpu.core_type = #tpu.core_type<tc>, window_params = [{transform_indices = @transform_0, window_bounds = array<i64: 8, 32>}, {transform_indices = @transform_1, window_bounds = array<i64: 8, 32>}, {pipeline_mode = #tpu.pipeline_mode<synchronous>, transform_indices = @transform_2, window_bounds = array<i64: 32, 32>}, {pipeline_mode = #tpu.pipeline_mode<synchronous>, transform_indices = @transform_3, window_bounds = array<i64: 32, 32>}, {pipeline_mode = #tpu.pipeline_mode<synchronous>, transform_indices = @transform_4, window_bounds = array<i64: 1, 32>}, {transform_indices = @transform_5, window_bounds = array<i64: 8, 32>}]} {
    %c0 = arith.constant 0 : index
    %c0_0 = arith.constant 0 : index
    %0 = vector.load %arg1[%c0, %c0_0] : memref<8x32xf32, #tpu.memory_space<vmem>>, vector<8x32xf32>
    %c0_1 = arith.constant 0 : index
    %c0_2 = arith.constant 0 : index
    %1 = vector.load %arg3[%c0_1, %c0_2] : memref<32x32xf32, #tpu.memory_space<vmem>>, vector<32x32xf32>
    %cst = arith.constant dense<0.000000e+00> : vector<8x32xf32>
    %2 = tpu.matmul %0, %1, %cst {dimension_numbers = #tpu.dot_dimension_numbers<[1], [0], [0], [1], [0, 0, 1, 1], [], []>} : vector<8x32xf32>, vector<32x32xf32>, vector<8x32xf32> -> vector<8x32xf32>
    %c0_3 = arith.constant 0 : index
    %c0_4 = arith.constant 0 : index
    %3 = vector.load %arg2[%c0_3, %c0_4] : memref<8x32xf32, #tpu.memory_space<vmem>>, vector<8x32xf32>
    %c0_5 = arith.constant 0 : index
    %c0_6 = arith.constant 0 : index
    %4 = vector.load %arg4[%c0_5, %c0_6] : memref<32x32xf32, #tpu.memory_space<vmem>>, vector<32x32xf32>
    %cst_7 = arith.constant dense<0.000000e+00> : vector<8x32xf32>
    %5 = tpu.matmul %3, %4, %cst_7 {dimension_numbers = #tpu.dot_dimension_numbers<[1], [0], [0], [1], [0, 0, 1, 1], [], []>} : vector<8x32xf32>, vector<32x32xf32>, vector<8x32xf32> -> vector<8x32xf32>
    %6 = arith.addf %2, %5 : vector<8x32xf32>
    %c0_8 = arith.constant 0 : index
    %c0_9 = arith.constant 0 : index
    %7 = vector.load %arg5[%c0_8, %c0_9] : memref<1x32xf32, #tpu.memory_space<vmem>>, vector<1x32xf32>
    %8 = vector.broadcast %7 : vector<1x32xf32> to vector<8x32xf32>
    %9 = arith.addf %6, %8 : vector<8x32xf32>
    %c0_10 = arith.constant 0 : index
    %c0_11 = arith.constant 0 : index
    %10 = vector.load %arg6[%c0_10, %c0_11] : memref<8x32xf32, #tpu.memory_space<vmem>>, vector<8x32xf32>
    tpu.vector_store %arg6[%c0_10, %c0_11], %9 {strides = array<i32>} : memref<8x32xf32, #tpu.memory_space<vmem>>, vector<8x32xf32>,
    return
  }
  func.func @transform_0(%arg0: i32) -> (i32, i32) {
    %c0_i32 = arith.constant 0 : i32
    %c0_i32_0 = arith.constant 0 : i32
    return %arg0, %c0_i32 : i32, i32
  }
  func.func @transform_1(%arg0: i32) -> (i32, i32) {
    %c0_i32 = arith.constant 0 : i32
    %c0_i32_0 = arith.constant 0 : i32
    return %arg0, %c0_i32 : i32, i32
  }
  func.func @transform_2(%arg0: i32) -> (i32, i32) {
    %c0_i32 = arith.constant 0 : i32
    %c0_i32_0 = arith.constant 0 : i32
    %c0_i32_1 = arith.constant 0 : i32
    return %c0_i32, %c0_i32_0 : i32, i32
  }
  func.func @transform_3(%arg0: i32) -> (i32, i32) {
    %c0_i32 = arith.constant 0 : i32
    %c0_i32_0 = arith.constant 0 : i32
    %c0_i32_1 = arith.constant 0 : i32
    return %c0_i32, %c0_i32_0 : i32, i32
  }
  func.func @transform_4(%arg0: i32) -> (i32, i32) {
    %c0_i32 = arith.constant 0 : i32
    %c0_i32_0 = arith.constant 0 : i32
    %c0_i32_1 = arith.constant 0 : i32
    return %c0_i32, %c0_i32_0 : i32, i32
  }
  func.func @transform_5(%arg0: i32) -> (i32, i32) {
    %c0_i32 = arith.constant 0 : i32
    %c0_i32_0 = arith.constant 0 : i32
    return %arg0, %c0_i32 : i32, i32
  }
}

</mosaic_0001>

<bundles_post_ra>
// kernel: fwd.1
= control target key start
LH: loop header
LB: loop body
LE: loop exit
PB: predicated region body
PF: predicated region fallthrough
CT: control target
= control target key end

     0   :  { %s1261_s0 = inlined_call_operand.hbm [shape: f32[16,32], index: 0, kind: input, shape index: {}]   ;;  %s1262_s1 = inlined_call_operand.hbm [shape: f32[16,32], index: 1, kind: input, shape index: {}]   ;;  %s1263_s2 = inlined_call_operand.hbm [shape: f32[32,32], index: 2, kind: input, shape index: {}]   ;;  %s1264_s3 = inlined_call_operand.hbm [shape: f32[32,32], index: 3, kind: input, shape index: {}]   ;;  %s1265_s4 = inlined_call_operand.vmem [shape: f32[1,32], index: 4, kind: input, shape index: {}]   ;;  %s1266_s5 = inlined_call_operand.hbm [shape: f32[16,32], index: 5, kind: output, shape index: {}]  }
   0x1   :  { %1271 = sst [smem:[#allocation16_spill]] %s1263_s2 }
   0x2   :  { %1272 = sst [smem:[#allocation17_spill]] %s1264_s3 }
   0x3   :  { %10 = vsyncpa [#allocation3], 0 }
   0x4   :  { %12 = vsyncpa [#allocation3 + $0x1], 0 }
   0x5   :  { %13 = vsyncpa [#allocation6], 0 }
   0x6   :  { %15 = vsyncpa [#allocation6 + $0x1], 0 }
   0x7   :  { %16 = vsyncpa [#allocation9], 0 }
   0x8   :  { %17 = vsyncpa [#allocation4], 0 }
   0x9   :  { %19 = vsyncpa [#allocation4 + $0x1], 0  ;;  %s977_s18 = smov 0   ;;  %s979_s19 = smov 0  }
   0xa   :  { %s981_s20 = smov 0   ;;  %s983_s21 = smov 0  }
   0xb LB: > { %s998_s22 = sadd.s32 4294967295, %s935_s21   ;;  %s598_s23 = sadd.s32 4294967294, %s935_s21   ;;  %s935_s21 = sphi %s983_s21, %s1294_s21   ;;  %s931_s20 = sphi %s981_s20, %s1293_s20   ;;  %s927_s19 = sphi %s979_s19, %s1292_s19   ;;  %s923_s18 = sphi %s977_s18, %s1291_s18  }
   0xc   : > { %p45_p0 = scmp.ne.s32.totalorder %s927_s19, %s923_s18  ;;  %p1267_p1 = scmp.eq.s32.totalorder %s998_s22, 0 }
   0xd   : > { %p164_p3 = scmp.eq.s32.totalorder %s598_s23, 1  ;;  %p599_p5 = scmp.ge.s32.totalorder %s935_s21, 1 }
   0xe   : > { %p1007_p4 = por %p1267_p1, %p45_p0  ;;  %p171_p7 = scmp.lt.s32.totalorder %s935_s21, 3 }
   0xf   : > { %p1012_p6 = por %p164_p3, %p45_p0  ;;  %s937_s27 = smov [#allocation7]  }
  0x10   : > { %s1273_s24 = scalar_select %p1007_p4, 1, 0 }
  0x11   : > { %s1274_s25 = scalar_select %p1012_p6, 1, 0 }
  0x12   : > { %p1017_p8 = pnand %p599_p5, %p171_p7  ;;  %s183_s28 = sshll.u32 %s937_s27, 4  ;;  %s1021_s28 = int_to_ptr.vmem [resolvable:$true] %s183_s28 }
  0x13   : > { %s938_s30 = smov [#allocation8]   ;;  %s1277_s2 = sld [smem:[#allocation16_spill]] }
  0x14   : > { %s1275_s26 = scalar_select %p1017_p8, 1, 0 }
  0x15   : > { %p678_p9 = pneg %p1017_p8  ;;  %s196_s6 = sshll.u32 %s938_s30, 4  ;;  %s1032_s6 = int_to_ptr.vmem [resolvable:$true] %s196_s6 }
  0x17   : > { %p1028_p11 = pnand %p678_p9, %p1267_p1 }
  0x19   : > { %s741_s9 = scalar_lea.hbm %s1277_s2, 512  ;;  %p743_p13 = pneg %p1028_p11 }
  0x1a   : > { %p742_p12 = scmp.ne.s32.totalorder %s1277_s2, %s741_s9  ;;  %p748_p5 = scmp.lt.u32.totalorder %s741_s9, %s1277_s2 }
  0x1c   : > { %p744_p0 = pnand %p743_p13, %p742_p12 }
  0x1e   : > { %p745_p3 = pneg %p744_p0 }
  0x20   : > { %p750_p7 = pnand %p748_p5, %p745_p3 }
  0x22   : > { %753 = shalt.err (!%p750_p7)
}
  0x23   : > { %s754_s14 = scalar_lea.vmem %s1021_s28, 512  ;;  %p762_p2 = scmp.lt.s32.totalorder %s1021_s28, %s1021_s28 }
  0x24   : > { %p755_p9 = scmp.ne.s32.totalorder %s1021_s28, %s754_s14  ;;  %p763_p12 = scmp.lt.s32.totalorder %s754_s14, %s754_s14 }
  0x26   : > { %p757_p10 = pnand %p755_p9, %p743_p13  ;;  %p764_p0 = por %p763_p12, %p762_p2 }
  0x28   : > { %p758_p1 = pneg %p757_p10 }
  0x2a   : > { %p765_p6 = pnand %p764_p0, %p758_p1 }
  0x2c   : > { %768 = shalt.err (!%p765_p6)
}
  0x2d   : > { %s939_s15 = smov 128   ;;  %s940_s16 = smov 8  }
  0x2e   : > { %681 = dma.hbm_to_vmem [thread:$0]  (!%p1028_p11), %s1277_s2, 512, %s1021_s28, [#allocation6], %s939_s15, %s939_s15, %s940_s16  }
  0x2f   : > { %s1278_s3 = sld [smem:[#allocation17_spill]] }
  0x35   : > { %s769_s7 = scalar_lea.hbm %s1278_s3, 512 }
  0x36   : > { %p770_p2 = scmp.ne.s32.totalorder %s1278_s3, %s769_s7  ;;  %p776_p10 = scmp.lt.u32.totalorder %s769_s7, %s1278_s3 }
  0x38   : > { %p772_p1 = pnand %p770_p2, %p743_p13 }
  0x3a   : > { %p773_p6 = pneg %p772_p1 }
  0x3c   : > { %p778_p3 = pnand %p776_p10, %p773_p6 }
  0x3e   : > { %781 = shalt.err (!%p778_p3)
}
  0x3f   : > { %s782_s28 = scalar_lea.vmem %s1032_s6, 512  ;;  %p790_p12 = scmp.lt.s32.totalorder %s1032_s6, %s1032_s6 }
  0x40   : > { %p783_p5 = scmp.ne.s32.totalorder %s1032_s6, %s782_s28  ;;  %p791_p0 = scmp.lt.s32.totalorder %s782_s28, %s782_s28 }
  0x42   : > { %p785_p7 = pnand %p783_p5, %p743_p13  ;;  %p792_p2 = por %p791_p0, %p790_p12 }
  0x44   : > { %p786_p9 = pneg %p785_p7 }
  0x46   : > { %p793_p1 = pnand %p792_p2, %p786_p9 }
  0x48   : > { %796 = shalt.err (!%p793_p1)
}
  0x49   : > { %684 = dma.hbm_to_vmem [thread:$0]  (!%p1028_p11), %s1278_s3, 512, %s1032_s6, [#allocation9], %s939_s15, %s939_s15, %s940_s16  }
  0x4a   : > { %s1087_s14 = sadd.s32 1, %s935_s21   ;;  %s32_s29 = sadd.s32 1, %s931_s20 }
  0x4b   : > { %s29_s17 = ssub.s32 %s935_s21, %s1087_s14  ;;  %p39_p13 = scmp.ne.s32.totalorder %s931_s20, %s927_s19 }
  0x4c   : > { %p30_p6 = scmp.eq.s32.totalorder %s29_s17, 0  ;;  %p40_p10 = scmp.eq.s32.totalorder %s935_s21, 0 }
  0x4d   : > { %p1279_p3 = scmp.eq.s32.totalorder %s998_s22, 1  ;;  %p698_p7 = scmp.lt.s32.totalorder %s935_s21, 2 }
  0x4e   : > { %s1103_s27 = scalar_select %p30_p6, %s931_s20, %s32_s29  }
  0x4f   : > { %p1097_p5 = por %p1279_p3, %p39_p13  ;;  %p41_p9 = por %p40_p10, %p39_p13 }
  0x50   : > { %s213_s30 = sand.u32 1, %s931_s20   ;;  %s604_s15 = sshll.u32 %s935_s21, 7 }
  0x51   : > { %s1280_s23 = scalar_select %p1097_p5, 1, 0 }
  0x52   : > { %s1106_s6 = sshll.u32 %s213_s30, 3  ;;  %s1112_s8 = scalar_lea.hbm %s1261_s0, %s604_s15 }
  0x53   : > { %s217_s9 = scalar_lea.vmem [#allocation2], %s1106_s6  ;;  %p1117_p11 = pnand %p698_p7, %p41_p9 }
  0x54   : > { %s224_s10 = sshll.u32 %s217_s9, 4  ;;  %s1124_s13 = scalar_lea.hbm %s1262_s1, %s604_s15  ;;  %s1115_s10 = int_to_ptr.vmem [resolvable:$true] %s224_s10 }
  0x55   : > { %s231_s29 = sand.u32 1, %s935_s21   ;;  %s214_s17 = scalar_lea.sflag [#allocation3], %s213_s30 }
  0x56   : > { %s797_s16 = scalar_lea.hbm %s1112_s8, 128  ;;  %p799_p0 = pneg %p1117_p11 }
  0x57   : > { %p798_p12 = scmp.ne.s32.totalorder %s1112_s8, %s797_s16  ;;  %s802_s2 = scalar_lea.hbm %s1261_s0, 256 }
  0x58   : > { %p803_p13 = scmp.lt.u32.totalorder %s1112_s8, %s1261_s0  ;;  %p804_p6 = scmp.lt.u32.totalorder %s802_s2, %s797_s16 }
  0x59   : > { %p800_p2 = pnand %p799_p0, %p798_p12  ;;  %p806_p3 = scmp.lt.u32.totalorder %s797_s16, %s1112_s8 }
  0x5a   : > { %p805_p10 = por %p804_p6, %p803_p13 }
  0x5b   : > { %p801_p1 = pneg %p800_p2 }
  0x5c   : > { %p807_p7 = por %p806_p3, %p805_p10 }
  0x5e   : > { %p808_p9 = pnand %p807_p7, %p801_p1 }
  0x60   : > { %811 = shalt.err (!%p808_p9)
}
  0x61   : > { %s812_s30 = scalar_lea.vmem %s1115_s10, 128  ;;  %s941_s15 = smov [#allocation2]  }
  0x62   : > { %p813_p12 = scmp.ne.s32.totalorder %s1115_s10, %s812_s30  ;;  %s817_s12 = sshll.u32 %s941_s15, 4  ;;  %s818_s12 = int_to_ptr.vmem [resolvable:$false] %s817_s12 }
  0x63   : > { %s819_s3 = scalar_lea.vmem %s818_s12, 256  ;;  %p820_p4 = scmp.lt.s32.totalorder %s1115_s10, %s818_s12 }
  0x64   : > { %p815_p2 = pnand %p813_p12, %p799_p0  ;;  %p821_p13 = scmp.lt.s32.totalorder %s819_s3, %s812_s30 }
  0x66   : > { %p816_p5 = pneg %p815_p2  ;;  %p822_p6 = por %p821_p13, %p820_p4 }
  0x68   : > { %p823_p10 = pnand %p822_p6, %p816_p5 }
  0x6a   : > { %826 = shalt.err (!%p823_p10)
}
  0x6b   : > { %688 = dma.hbm_to_vmem [thread:$0]  (!%p1117_p11), %s1112_s8, 128, %s1115_s10, %s214_s17  }
  0x6c   : > { %s235_s2 = scalar_lea.vmem [#allocation5], %s1106_s6  ;;  %s232_s7 = scalar_lea.sflag [#allocation6], %s231_s29 }
  0x6d   : > { %s242_s16 = sshll.u32 %s235_s2, 4  ;;  %s827_s9 = scalar_lea.hbm %s1124_s13, 128  ;;  %s243_s16 = int_to_ptr.vmem [resolvable:$true] %s242_s16 }
  0x6e   : > { %p828_p4 = scmp.ne.s32.totalorder %s1124_s13, %s827_s9  ;;  %s832_s15 = scalar_lea.hbm %s1262_s1, 256 }
  0x6f   : > { %p833_p3 = scmp.lt.u32.totalorder %s1124_s13, %s1262_s1  ;;  %p834_p7 = scmp.lt.u32.totalorder %s832_s15, %s827_s9 }
  0x70   : > { %p830_p5 = pnand %p828_p4, %p799_p0  ;;  %p836_p12 = scmp.lt.u32.totalorder %s827_s9, %s1124_s13 }
  0x71   : > { %p835_p9 = por %p834_p7, %p833_p3 }
  0x72   : > { %p831_p1 = pneg %p830_p5 }
  0x73   : > { %p837_p2 = por %p836_p12, %p835_p9 }
  0x75   : > { %p838_p13 = pnand %p837_p2, %p831_p1 }
  0x77   : > { %841 = shalt.err (!%p838_p13)
}
  0x78   : > { %s842_s6 = scalar_lea.vmem %s243_s16, 128  ;;  %s942_s8 = smov [#allocation5]  }
  0x79   : > { %p843_p6 = scmp.ne.s32.totalorder %s243_s16, %s842_s6  ;;  %s847_s10 = sshll.u32 %s942_s8, 4  ;;  %s848_s10 = int_to_ptr.vmem [resolvable:$false] %s847_s10 }
  0x7a   : > { %s849_s29 = scalar_lea.vmem %s848_s10, 256  ;;  %p850_p5 = scmp.lt.s32.totalorder %s243_s16, %s848_s10 }
  0x7b   : > { %p845_p10 = pnand %p843_p6, %p799_p0  ;;  %p851_p8 = scmp.lt.s32.totalorder %s849_s29, %s842_s6 }
  0x7d   : > { %p846_p4 = pneg %p845_p10  ;;  %p852_p3 = por %p851_p8, %p850_p5 }
  0x7f   : > { %p853_p7 = pnand %p852_p3, %p846_p4 }
  0x81   : > { %856 = shalt.err (!%p853_p7)
}
  0x82   : > { %691 = dma.hbm_to_vmem [thread:$0]  (!%p1117_p11), %s1124_s13, 128, %s243_s16, %s232_s7  }
  0x83   : > { %p1282_p1 = scmp.ne.s32.totalorder %s1275_s26, 0 }
  0x84   : > { %s1177_s17 = sand.u32 (!%p1282_p1), 1, %s927_s19   ;;  %p1283_p8 = scmp.ne.s32.totalorder (!%p1282_p1), %s1273_s24, 0 }
  0x85   : > { %251 = sbr.rel (%p1282_p1) target bundleno = 393 (0x189), region = 40  ;;  %s1180_s2 = sshll.u32 (!%p1282_p1), %s1177_s17, 3 }
  0x86   : > { %s254_s9 = scalar_lea.sflag (!%p1282_p1), [#allocation3], %s1177_s17  ;;  %s257_s28 = scalar_lea.vmem (!%p1282_p1), [#allocation2], %s1180_s2 }
  0x8c   : > { %902 = dma.done.wait (%p1283_p8), %s254_s9, 128  }
  0x8d   : > { %904 = vsyncadd (%p1283_p8), %s254_s9, 4294967168  ;;  %s262_s26 = sand.u32 1, %s998_s22   ;;  %s266_s13 = scalar_lea.vmem [#allocation5], %s1180_s2 }
  0x8e   : > { %s263_s11 = scalar_lea.sflag [#allocation6], %s262_s26 }
  0x8f   : > { %906 = dma.done.wait (%p1283_p8), %s263_s11, 128  }
  0x90   : > { %908 = vsyncadd (%p1283_p8), %s263_s11, 4294967168  ;;  %p1284_p11 = scmp.eq.s32.totalorder %s998_s22, 0 }
  0x92   : > { %910 = dma.done.wait (%p1284_p11), [#allocation6], 512   ;;  %p1285_p0 = pmov %p1284_p11 }
  0x94   : > { %912 = vsyncadd (%p1285_p0), [#allocation6], 4294966784  ;;  %p1286_p9 = pmov %p1285_p0 }
  0x95   : > { %p1287_p12 = pmov %p1285_p0 }
  0x96   : > { %914 = dma.done.wait (%p1286_p9), [#allocation9], 512  }
  0x97   : > { %916 = vsyncadd (%p1287_p12), [#allocation9], 4294966784  ;;  %v943_v0 = vmov 0.0|0.0   ;;  %vm944_vm0 = vmmov 0   ;;  %v945_v1 = vmov 0.0   ;;  %v312_v2 = vld [vmem:[#allocation8] sm:$0xff] }
  0x98   : > { %652 = vmatprep.subr.bf16.mxu0 %v943_v0  ;;  %658 = vmatprep.subr.bf16.mxu1 %v943_v0  ;;  %v313_v3 = vld [vmem:[#allocation8 + $0x8] sm:$0xff]  ;;  %v307_v4 = vld [vmem:[#allocation7] sm:$0xff]  ;;  %v314_v7 = vld [vmem:[#allocation8 + $0x10] sm:$0xff]  ;;  %vm316_vm1 = vcmask 261120   ;;  %s617_s7 = sshll.u32 %s998_s22, 7  ;;  %s305_s30 = scalar_lea.vmem [#allocation10], %s1180_s2 }
  0x99   : > { %638 = vmatprep.mubr.msk.f32.mxu0 %vm944_vm0, %v945_v1  ;;  %649 = vmatprep.mubr.msk.f32.mxu1 %vm944_vm0, %v945_v1  ;;  %v653_v5 = vpack.c.bf16 %v313_v3, %v312_v2  ;;  %v308_v6 = vld [vmem:[#allocation7 + $0x8] sm:$0xff]  ;;  %v315_v8 = vld [vmem:[#allocation8 + $0x18] sm:$0xff]  ;;  %v309_v10 = vld [vmem:[#allocation7 + $0x10] sm:$0xff]  ;;  %s486_s15 = sshll.u32 %s305_s30, 4  ;;  %s1216_s6 = scalar_lea.hbm %s1266_s5, %s617_s7  ;;  %s1218_s15 = int_to_ptr.vmem [resolvable:$true] %s486_s15 }
  0x9a   : > { %v659_v9 = vpack.c.bf16 %v308_v6, %v307_v4  ;;  %v310_v11 = vld [vmem:[#allocation7 + $0x18] sm:$0xff]  ;;  %v656_v12 = vpack.c.bf16 %v315_v8, %v314_v7  ;;  %v306_v15 = vld [vmem:[%s257_s28] sm:$0xff]  ;;  %s473_s8 = scalar_lea.sflag [#allocation4], %s1177_s17  ;;  %s857_s10 = scalar_lea.vmem %s1218_s15, 128 }
  0x9b   : > { %654 = vmatpush3.bf16.msra.mxu0 %v653_v5  ;;  %v662_v13 = vpack.c.bf16 %v310_v11, %v309_v10  ;;  %v311_v14 = vld [vmem:[%s266_s13] sm:$0xff]  ;;  %v615_v18 = vld [vmem:[%s1265_s4] ss:$0 sm:$0xff]  ;;  %p858_p2 = scmp.ne.s32.totalorder %s1218_s15, %s857_s10  ;;  %p1288_p13 = scmp.ne.s32.totalorder %s1280_s23, 0 }
  0x9c   : > { %660 = vmatpush3.bf16.msra.mxu1 %v659_v9  ;;  %655 = vmatprep.subr.bf16.mxu0 %v943_v0  ;;  %s946_s22 = smov [#allocation10]  }
  0x9d   : > { %661 = vmatprep.subr.bf16.mxu1 %v943_v0  ;;  %p859_p6 = pnand %p858_p2, %p1288_p13  ;;  %s861_s29 = sshll.u32 %s946_s22, 4  ;;  %s862_s29 = int_to_ptr.vmem [resolvable:$false] %s861_s29 }
  0x9e   : > { %s863_s2 = scalar_lea.vmem %s862_s29, 256  ;;  %p864_p4 = scmp.lt.s32.totalorder %s1218_s15, %s862_s29 }
  0x9f   : > { %657 = vmatpush3.bf16.msra.mxu0 %v656_v12  ;;  %p860_p10 = pneg %p859_p6  ;;  %p865_p5 = scmp.lt.s32.totalorder %s863_s2, %s857_s10 }
  0xa0   : > { %663 = vmatpush3.bf16.msra.mxu1 %v662_v13 }
  0xa1   : > { %p866_p3 = por %p865_p5, %p864_p4 }
  0xa2   : > { %639 = vmatmul.mubr.msk.f32.vlgmr.msra.gmra.mrb[0].mxu0 %vm316_vm1, %v311_v14 }
  0xa3   : > { %650 = vmatmul.mubr.msk.f32.vlgmr.msra.gmra.mrb[0].mxu1 %vm316_vm1, %v306_v15  ;;  %p867_p7 = pnand %p866_p3, %p860_p10 }
 0x175   : > { %v386_v16 = vpop.f32.mrb[0].mxu0 }
 0x176   : > { %v459_v17 = vpop.f32.mrb[0].mxu1  ;;  %v640_v19 = vpop.f32.mrb[1].mxu0 }
 0x177   : > { %v460_v20 = vadd.f32 %v459_v17, %v386_v16  ;;  %v651_v21 = vpop.f32.mrb[1].mxu1 }
 0x179   : > { %v470_v22 = vadd.f32 %v615_v18, %v460_v20 }
 0x17b   : > { %471 = vst.msk [vmem:[%s305_s30] sm:$0xff] %vm316_vm1, %v470_v22 }
 0x17c   : > { %870 = shalt.err (!%p867_p7)
}
 0x17d   : > { %s871_s17 = scalar_lea.hbm %s1216_s6, 128  ;;  %s875_s26 = scalar_lea.hbm %s1266_s5, 256 }
 0x17e   : > { %p872_p1 = scmp.ne.s32.totalorder %s1216_s6, %s871_s17  ;;  %p876_p0 = scmp.lt.u32.totalorder %s1216_s6, %s1266_s5 }
 0x17f   : > { %p877_p9 = scmp.lt.u32.totalorder %s875_s26, %s871_s17  ;;  %p879_p2 = scmp.lt.u32.totalorder %s871_s17, %s1216_s6 }
 0x180   : > { %p873_p8 = pnand %p872_p1, %p1288_p13 }
 0x181   : > { %p878_p12 = por %p877_p9, %p876_p0 }
 0x182   : > { %p874_p11 = pneg %p873_p8 }
 0x183   : > { %p880_p6 = por %p879_p2, %p878_p12 }
 0x185   : > { %p881_p10 = pnand %p880_p6, %p874_p11 }
 0x187   : > { %884 = shalt.err (!%p881_p10)
}
 0x188   : > { %676 = dma.vmem_to_hbm [thread:$0]  (%p1288_p13), %s1218_s15, 128, %s1216_s6, %s473_s8  }
 0x189 PF: > { %s498_s24 = sand.u32 1, %s923_s18   ;;  %p1289_p4 = scmp.ne.s32.totalorder %s1274_s25, 0 }
 0x18a   : > { %p1290_p5 = scmp.ge.s32.totalorder %s935_s21, 2  ;;  %s499_s16 = scalar_lea.sflag [#allocation4], %s498_s24 }
 0x18c   : > { %p693_p3 = pnand %p1290_p5, %p1289_p4 }
 0x18e   : > { %918 = dma.done.wait (!%p693_p3), %s499_s16, 128  }
 0x18f   : > { %920 = vsyncadd (!%p693_p3), %s499_s16, 4294967168  ;;  %p22_p7 = scmp.ge.s32.totalorder %s1087_s14, 4   ;;  %s1291_s18 = smov %s927_s19 }
 0x190   : > { %s1292_s19 = smov %s931_s20  ;;  %s1293_s20 = smov %s1103_s27 }
 0x191   : > { %s1294_s21 = smov %s1087_s14  ;;  %24 = sbr.rel (!%p22_p7) target bundleno = 11 (0xb), region = 106 }
 0x198   :  { %504 = vsyncpa [#allocation3], 1 }
 0x199   :  { %506 = vsyncpa [#allocation3 + $0x1], 1 }
 0x19a   :  { %507 = vsyncpa [#allocation6], 1 }
 0x19b   :  { %509 = vsyncpa [#allocation6 + $0x1], 1 }
 0x19c   :  { %510 = vsyncpa [#allocation9], 1 }
 0x19d   :  { %511 = vsyncpa [#allocation4], 1 }
 0x19e   :  { %513 = vsyncpa [#allocation4 + $0x1], 1 }

</bundles_post_ra>
